<compile_context>
chip_gen: v5e
topology: v5e:2x2
jax: 0.10.0
libtpu: 0.0.40
codegen_flags: <defaults>
</compile_context>

<pallas_src>
import jax
import jax.numpy as jnp
from jax.experimental import pallas as pl
from jax.experimental.pallas import tpu as pltpu


# ---------------------------------------------------------------------------
# Fused prototype + similarity kernel (bb batch elements per grid step)
# ---------------------------------------------------------------------------
def _proto_sim_kernel(test_ref, supp_ref, tgt_ref, sim_ref, proto_ref):
    # Blocks (leading batch-block dim bb):
    #   test_ref : (bb, S, Lt, D)   raw test reps; mean over S fused in-kernel
    #   supp_ref : (bb, K,  D)      K = support_size * support_seq_len
    #   tgt_ref  : (bb, K,  T)      one-hot targets, UNPADDED tag dim
    #   sim_ref  : (bb, Lt, T)
    #   proto_ref: (bb, T,  D)
    s_count = test_ref.shape[1]

    # mean over the support_size axis; f32 cast done in-kernel (no wrapper copy)
    test_mean = jnp.sum(test_ref[...].astype(jnp.float32), axis=1) * (1.0 / s_count)

    supp = supp_ref[...].astype(jnp.float32)              # (bb, K, D)
    tgt = tgt_ref[...].astype(jnp.float32)                # (bb, K, T)

    # tag_count[b, t] = sum_k targets[b, k, t]
    tag_count = jnp.sum(tgt, axis=1, keepdims=True)       # (bb, 1, T)
    inv_count = pl.reciprocal(tag_count + 1e-4, approx=False)

    # prototype = (targets * 1/count)^T @ support : scaling the one-hot columns
    # first keeps the broadcast lane-aligned and fuses the divide into the
    # single MXU contraction (exact for one-hot targets).
    tgt_scaled = tgt * inv_count                           # (bb, K, T)
    proto = jnp.einsum('bkt,bkd->btd', tgt_scaled, supp,
                       preferred_element_type=jnp.float32)  # (bb, T, D)

    # sim = test_mean @ prototype^T
    sim = jnp.einsum('bld,btd->blt', test_mean, proto,
                     preferred_element_type=jnp.float32)    # (bb, Lt, T)

    proto_ref[...] = proto.astype(proto_ref.dtype)
    sim_ref[...] = sim.astype(sim_ref.dtype)


def prototype_similarity_forward(test_reps, support_reps, test_output_mask,
                                 support_output_mask, support_targets,
                                 label_reps=None):
    """Matches PrototypeSimilarityScorer.forward (sim_func = reps_dot).

    test_output_mask / support_output_mask / label_reps are unused by the
    reference forward (reps_dot path) and are ignored here too.
    """
    del test_output_mask, support_output_mask, label_reps

    B, S, Lt, D = test_reps.shape
    Ls = support_reps.shape[2]
    T = support_targets.shape[-1]

    # Reference's defensive branch: zero the targets on a support_seq_len
    # mismatch (device placement detail of the original omitted).
    if support_targets.shape[-2] != Ls:
        support_targets = jnp.zeros((B, S, Ls, T), jnp.float32)

    K = S * Ls
    # Merging adjacent dims is a free (layout-preserving) reshape under XLA;
    # no dtype casts or padding in the wrapper.
    supp_flat = support_reps.reshape(B, K, D)
    tgt_flat = support_targets.reshape(B, K, T)

    # ---- Batch-block choice:
    #  (a) keep the double-buffered working set within ~24 MiB (safe on v7x's
    #      64 MiB VMEM / 2 TCs, comfortable on v5e/v6e),
    #  (b) keep >= 2 grid steps when B >= 2 so the "parallel" axis feeds both
    #      v7x TensorCores,
    #  (c) divide B evenly.
    per_batch_bytes = 4 * (S * Lt * D + K * D + K * T + Lt * T + T * D)
    budget = 24 << 20
    bb = max(1, min(B, budget // max(2 * per_batch_bytes, 1)))
    if B >= 2:
        bb = max(1, min(bb, B // 2))
    while B % bb:
        bb -= 1
    num_blocks = B // bb

    # Scoped-VMEM hint derived from the actual double-buffered block bytes
    # (+ headroom for MXU/VPU temporaries), clamped well under v7x's 64 MiB.
    vmem_limit = int(min(max(4 * bb * per_batch_bytes, 32 << 20), 56 << 20))

    sim_score, prototype_reps = pl.pallas_call(
        _proto_sim_kernel,
        out_shape=(jax.ShapeDtypeStruct((B, Lt, T), jnp.float32),
                   jax.ShapeDtypeStruct((B, T, D), jnp.float32)),
        grid=(num_blocks,),
        in_specs=[pl.BlockSpec((bb, S, Lt, D), lambda i: (i, 0, 0, 0)),
                  pl.BlockSpec((bb, K, D), lambda i: (i, 0, 0)),
                  pl.BlockSpec((bb, K, T), lambda i: (i, 0, 0))],
        out_specs=(pl.BlockSpec((bb, Lt, T), lambda i: (i, 0, 0)),
                   pl.BlockSpec((bb, T, D), lambda i: (i, 0, 0))),
        compiler_params=pltpu.CompilerParams(
            dimension_semantics=("parallel",),
            vmem_limit_bytes=vmem_limit),
    )(test_reps, supp_flat, tgt_flat)

    return sim_score, prototype_reps


# ---------------------------------------------------------------------------
# Pure-JAX reference (mirrors the PyTorch code, for a correctness check)
# ---------------------------------------------------------------------------
def _reference(test_reps, support_reps, support_targets):
    B, S, Lt, D = test_reps.shape
    Ls = support_reps.shape[2]
    T = support_targets.shape[-1]
    test_mean = jnp.mean(test_reps, axis=1)
    supp = support_reps.reshape(B * S, Ls, D).astype(jnp.float32)
    tgt = support_targets.reshape(B * S, Ls, T).astype(jnp.float32)
    sum_reps = jnp.einsum('bkt,bkd->btd', tgt, supp)
    sum_reps = jnp.sum(sum_reps.reshape(B, S, T, D), axis=1)
    tag_count = jnp.sum(tgt.reshape(B, S * Ls, T), axis=1)[..., None] + 1e-4
    proto = sum_reps / tag_count
    sim = jnp.einsum('bld,btd->blt', test_mean, proto)
    return sim, proto


if __name__ == "__main__":
    B, S, Lt, Ls, D, T = 2, 2, 8, 8, 32, 5

    key = jax.random.PRNGKey(0)
    k1, k2, k3 = jax.random.split(key, 3)

    test_reps = jax.random.normal(k1, (B, S, Lt, D), jnp.float32)
    support_reps = jax.random.normal(k2, (B, S, Ls, D), jnp.float32)
    test_output_mask = jnp.ones((B, Lt), jnp.float32)
    support_output_mask = jnp.ones((B, S, Ls), jnp.float32)
    tgt_idx = jax.random.randint(k3, (B, S, Ls), 0, T)
    support_targets = jax.nn.one_hot(tgt_idx, T, dtype=jnp.float32)

    fwd = jax.jit(prototype_similarity_forward)
    sim_score, prototype_reps = fwd(test_reps, support_reps, test_output_mask,
                                    support_output_mask, support_targets)
    jax.block_until_ready((sim_score, prototype_reps))

    assert sim_score.shape == (B, Lt, T), sim_score.shape
    assert prototype_reps.shape == (B, T, D), prototype_reps.shape

    sim_ref, proto_ref = _reference(test_reps, support_reps, support_targets)
    assert bool(jnp.all(jnp.isfinite(sim_score)))
    assert jnp.allclose(prototype_reps, proto_ref, rtol=1e-5, atol=1e-5), \
        float(jnp.max(jnp.abs(prototype_reps - proto_ref)))
    assert jnp.allclose(sim_score, sim_ref, rtol=1e-4, atol=1e-4), \
        float(jnp.max(jnp.abs(sim_score - sim_ref)))

    print("KERNEL_OK")
</pallas_src>

<mosaic_0001>
module attributes {stable_mosaic.version = 11 : i64} {
  func.func @_proto_sim_kernel(%arg0: i32, %arg1: memref<1x2x8x32xf32, #tpu.memory_space<vmem>>, %arg2: memref<1x16x32xf32, #tpu.memory_space<vmem>>, %arg3: memref<1x16x5xf32, #tpu.memory_space<vmem>>, %arg4: memref<1x8x5xf32, #tpu.memory_space<vmem>>, %arg5: memref<1x5x32xf32, #tpu.memory_space<vmem>>) attributes {dimension_semantics = [#tpu.dimension_semantics<parallel>], iteration_bounds = array<i64: 2>, scalar_prefetch = 0 : i64, scratch_operands = 0 : i64, tpu.core_type = #tpu.core_type<tc>, window_params = [{transform_indices = @transform_0, window_bounds = array<i64: 1, 2, 8, 32>}, {transform_indices = @transform_1, window_bounds = array<i64: 1, 16, 32>}, {transform_indices = @transform_2, window_bounds = array<i64: 1, 16, 5>}, {transform_indices = @transform_3, window_bounds = array<i64: 1, 8, 5>}, {transform_indices = @transform_4, window_bounds = array<i64: 1, 5, 32>}]} {
    %c0 = arith.constant 0 : index
    %c0_0 = arith.constant 0 : index
    %c0_1 = arith.constant 0 : index
    %c0_2 = arith.constant 0 : index
    %0 = vector.load %arg1[%c0, %c0_0, %c0_1, %c0_2] : memref<1x2x8x32xf32, #tpu.memory_space<vmem>>, vector<1x2x8x32xf32>
    %cst = arith.constant dense<0.000000e+00> : vector<1x8x32xf32>
    %1 = vector.multi_reduction <add>, %0, %cst [1] : vector<1x2x8x32xf32> to vector<1x8x32xf32>
    %cst_3 = arith.constant 5.000000e-01 : f32
    %2 = vector.broadcast %cst_3 : f32 to vector<1x8x32xf32>
    %3 = arith.mulf %1, %2 : vector<1x8x32xf32>
    %c0_4 = arith.constant 0 : index
    %c0_5 = arith.constant 0 : index
    %c0_6 = arith.constant 0 : index
    %4 = vector.load %arg2[%c0_4, %c0_5, %c0_6] : memref<1x16x32xf32, #tpu.memory_space<vmem>>, vector<1x16x32xf32>
    %c0_7 = arith.constant 0 : index
    %c0_8 = arith.constant 0 : index
    %c0_9 = arith.constant 0 : index
    %5 = vector.load %arg3[%c0_7, %c0_8, %c0_9] : memref<1x16x5xf32, #tpu.memory_space<vmem>>, vector<1x16x5xf32>
    %cst_10 = arith.constant dense<0.000000e+00> : vector<1x5xf32>
    %6 = vector.multi_reduction <add>, %5, %cst_10 [1] : vector<1x16x5xf32> to vector<1x5xf32>
    %7 = vector.shape_cast %6 : vector<1x5xf32> to vector<1x1x5xf32>
    %cst_11 = arith.constant 9.99999974E-5 : f32
    %8 = vector.broadcast %cst_11 : f32 to vector<1x1x5xf32>
    %9 = arith.addf %7, %8 : vector<1x1x5xf32>
    %10 = tpu.reciprocal %9 : vector<1x1x5xf32> -> vector<1x1x5xf32>
    %11 = vector.broadcast %10 : vector<1x1x5xf32> to vector<1x16x5xf32>
    %12 = arith.mulf %5, %11 : vector<1x16x5xf32>
    "tpu.trace_start"() <{level = 10 : i32, message = "bkt,bkd->btd"}> : () -> ()
    %cst_12 = arith.constant dense<0.000000e+00> : vector<1x5x32xf32>
    %13 = tpu.matmul %12, %4, %cst_12 {dimension_numbers = #tpu.dot_dimension_numbers<[1], [1], [2], [2], [0, 0, 0, 2, 1, 2], [0], [0]>} : vector<1x16x5xf32>, vector<1x16x32xf32>, vector<1x5x32xf32> -> vector<1x5x32xf32>
    "tpu.trace_stop"() : () -> ()
    "tpu.trace_start"() <{level = 10 : i32, message = "bld,btd->blt"}> : () -> ()
    %cst_13 = arith.constant dense<0.000000e+00> : vector<1x8x5xf32>
    %14 = tpu.matmul %3, %13, %cst_13 {dimension_numbers = #tpu.dot_dimension_numbers<[2], [2], [1], [1], [0, 0, 0, 1, 1, 1], [0], [0]>} : vector<1x8x32xf32>, vector<1x5x32xf32>, vector<1x8x5xf32> -> vector<1x8x5xf32>
    "tpu.trace_stop"() : () -> ()
    %c0_14 = arith.constant 0 : index
    %c0_15 = arith.constant 0 : index
    %c0_16 = arith.constant 0 : index
    %15 = vector.load %arg5[%c0_14, %c0_15, %c0_16] : memref<1x5x32xf32, #tpu.memory_space<vmem>>, vector<1x5x32xf32>
    tpu.vector_store %arg5[%c0_14, %c0_15, %c0_16], %13 {strides = array<i32>} : memref<1x5x32xf32, #tpu.memory_space<vmem>>, vector<1x5x32xf32>,
    %c0_17 = arith.constant 0 : index
    %c0_18 = arith.constant 0 : index
    %c0_19 = arith.constant 0 : index
    %16 = vector.load %arg4[%c0_17, %c0_18, %c0_19] : memref<1x8x5xf32, #tpu.memory_space<vmem>>, vector<1x8x5xf32>
    tpu.vector_store %arg4[%c0_17, %c0_18, %c0_19], %14 {strides = array<i32>} : memref<1x8x5xf32, #tpu.memory_space<vmem>>, vector<1x8x5xf32>,
    return
  }
  func.func @transform_0(%arg0: i32) -> (i32, i32, i32, i32) {
    %c0_i32 = arith.constant 0 : i32
    %c0_i32_0 = arith.constant 0 : i32
    %c0_i32_1 = arith.constant 0 : i32
    %c0_i32_2 = arith.constant 0 : i32
    return %arg0, %c0_i32, %c0_i32_0, %c0_i32_1 : i32, i32, i32, i32
  }
  func.func @transform_1(%arg0: i32) -> (i32, i32, i32) {
    %c0_i32 = arith.constant 0 : i32
    %c0_i32_0 = arith.constant 0 : i32
    %c0_i32_1 = arith.constant 0 : i32
    return %arg0, %c0_i32, %c0_i32_0 : i32, i32, i32
  }
  func.func @transform_2(%arg0: i32) -> (i32, i32, i32) {
    %c0_i32 = arith.constant 0 : i32
    %c0_i32_0 = arith.constant 0 : i32
    %c0_i32_1 = arith.constant 0 : i32
    return %arg0, %c0_i32, %c0_i32_0 : i32, i32, i32
  }
  func.func @transform_3(%arg0: i32) -> (i32, i32, i32) {
    %c0_i32 = arith.constant 0 : i32
    %c0_i32_0 = arith.constant 0 : i32
    %c0_i32_1 = arith.constant 0 : i32
    return %arg0, %c0_i32, %c0_i32_0 : i32, i32, i32
  }
  func.func @transform_4(%arg0: i32) -> (i32, i32, i32) {
    %c0_i32 = arith.constant 0 : i32
    %c0_i32_0 = arith.constant 0 : i32
    %c0_i32_1 = arith.constant 0 : i32
    return %arg0, %c0_i32, %c0_i32_0 : i32, i32, i32
  }
}

</mosaic_0001>

<bundles_post_ra>
// kernel: prototype_similarity_forward.1
= control target key start
LH: loop header
LB: loop body
LE: loop exit
PB: predicated region body
PF: predicated region fallthrough
CT: control target
= control target key end

     0   :  { %10 = vsyncpa [#allocation3], 0  ;;  %s790_s0 = inlined_call_operand.vmem [shape: f32[2,2,8,32], index: 0, kind: input, shape index: {}]   ;;  %s791_s1 = inlined_call_operand.hbm [shape: f32[2,16,32], index: 1, kind: input, shape index: {}]   ;;  %s792_s2 = inlined_call_operand.vmem [shape: f32[2,16,5], index: 2, kind: input, shape index: {}]   ;;  %s793_s3 = inlined_call_operand.vmem [shape: f32[2,8,5], index: 3, kind: output, shape index: {0}]   ;;  %s794_s4 = inlined_call_operand.vmem [shape: f32[2,5,32], index: 4, kind: output, shape index: {1}]  }
   0x1   :  { %12 = vsyncpa [#allocation3 + $0x1], 0  ;;  %s671_s15 = smov 0   ;;  %s673_s16 = smov 0  }
   0x2   :  { %s675_s17 = smov 0   ;;  %s677_s18 = smov 0  }
   0x3 LB: > { %s690_s19 = sadd.s32 4294967295, %s642_s18   ;;  %s693_s20 = sadd.s32 1, %s642_s18   ;;  %s642_s18 = sphi %s677_s18, %s801_s18   ;;  %s638_s17 = sphi %s675_s17, %s800_s17   ;;  %s634_s16 = sphi %s673_s16, %s799_s16   ;;  %s630_s15 = sphi %s671_s15, %s798_s15  }
   0x4   : > { %s48_s21 = ssub.s32 %s642_s18, %s693_s20  ;;  %s51_s22 = sadd.s32 1, %s638_s17 }
   0x5   : > { %p49_p0 = scmp.eq.s32.totalorder %s48_s21, 0  ;;  %p58_p1 = scmp.ne.s32.totalorder %s638_s17, %s634_s16 }
   0x6   : > { %p59_p2 = scmp.eq.s32.totalorder %s642_s18, 0  ;;  %p64_p3 = scmp.ne.s32.totalorder %s634_s16, %s630_s15 }
   0x7   : > { %s703_s23 = scalar_select %p49_p0, %s638_s17, %s51_s22  }
   0x8   : > { %p705_p4 = por %p59_p2, %p58_p1  ;;  %p65_p5 = scmp.eq.s32.totalorder %s690_s19, 0 }
   0x9   : > { %p540_p6 = scmp.lt.s32.totalorder %s642_s18, 2  ;;  %s174_s26 = sand.u32 1, %s638_s17  }
   0xa   : > { %p711_p7 = por %p65_p5, %p64_p3  ;;  %s515_s27 = sshll.u32 %s174_s26, 4 }
   0xb   : > { %s531_s28 = sshll.u32 %s642_s18, 4  ;;  %s178_s6 = scalar_lea.vmem [#allocation2], %s515_s27 }
   0xc   : > { %s183_s5 = scalar_lea.hbm %s791_s1, %s531_s28  ;;  %s186_s7 = sshll.u32 %s178_s6, 4  ;;  %s187_s7 = int_to_ptr.vmem [resolvable:$true] %s186_s7 }
   0xd   : > { %s184_s8 = sshll.u32 %s183_s5, 4  ;;  %p722_p8 = pnand %p540_p6, %p705_p4  ;;  %s185_s8 = int_to_ptr.hbm [resolvable:$true] %s184_s8 }
   0xe   : > { %p518_p9 = scmp.ge.s32.totalorder %s642_s18, 1  ;;  %s175_s10 = scalar_lea.sflag [#allocation3], %s174_s26 }
   0xf   : > { %s578_s11 = sshra.s32 %s185_s8, 4  ;;  %p582_p11 = pneg %p722_p8  ;;  %s579_s11 = int_to_ptr.hbm [resolvable:$true] %s578_s11 }
  0x10   : > { %s580_s12 = scalar_lea.hbm %s579_s11, 16  ;;  %s585_s15 = scalar_lea.hbm %s791_s1, 32 }
  0x11   : > { %p581_p10 = scmp.ne.s32.totalorder %s579_s11, %s580_s12  ;;  %p586_p0 = scmp.lt.s32.totalorder %s579_s11, %s791_s1 }
  0x12   : > { %p587_p1 = scmp.lt.s32.totalorder %s585_s15, %s580_s12 }
  0x13   : > { %p583_p12 = pnand %p582_p11, %p581_p10 }
  0x14   : > { %p588_p2 = por %p587_p1, %p586_p0 }
  0x15   : > { %p584_p13 = pneg %p583_p12 }
  0x17   : > { %p589_p3 = pnand %p588_p2, %p584_p13 }
  0x19   : > { %592 = shalt.err (!%p589_p3)
}
  0x1a   : > { %s644_s24 = smov 128   ;;  %s645_s26 = smov 8  }
  0x1b   : > { %539 = dma.hbm_to_vmem [thread:$0]  (!%p722_p8), %s185_s8, 256, %s187_s7, %s175_s10, %s644_s24, %s644_s24, %s645_s26  }
  0x1c   : > { %p202_p4 = scmp.lt.s32.totalorder %s642_s18, 3 }
  0x1e   : > { %p203_p5 = pnand %p518_p9, %p202_p4 }
  0x1f   : > { %s208_s27 = sand.u32 (!%p203_p5), 1, %s634_s16  }
  0x20   : > { %206 = sbr.rel (%p203_p5) target bundleno = 501 (0x1f5), region = 32  ;;  %s741_s28 = sshll.u32 (!%p203_p5), %s208_s27, 4 }
  0x21   : > { %s209_s29 = scalar_lea.sflag (!%p203_p5), [#allocation3], %s208_s27  ;;  %s212_s30 = scalar_lea.vmem (!%p203_p5), [#allocation2], %s741_s28 }
  0x25   : > { %625 = dma.done.wait (%p711_p7), %s209_s29, 256  }
  0x26   : > { %627 = vsyncadd (%p711_p7), %s209_s29, 4294967040  ;;  %p251_p6 = scmp.lt.s32.totalorder %s690_s19, 1  ;;  %vm280_vm0 = vcmask 39936   ;;  %v277_v10 = vld [vmem:[%s212_s30 + $0x8] sm:$0xff]  ;;  %v276_v25 = vld [vmem:[%s212_s30] sm:$0xff]  ;;  %vm339_vm5 = vcmask 130048  }
  0x27   : > { %357 = vmatpush.msra.mxu0 %v277_v10  ;;  %vm271_vm6 = vcmask 261120   ;;  %vm389_vm7 = vcmask 258048  }
  0x28   : > { %s803_s19 = smov (!%p251_p6, %s690_s19), 1 }
  0x29   : > { %s532_s18 = sshll.u32 %s803_s19, 4  ;;  %358 = vmatpush.msra.mxu0 %v276_v25  ;;  %s524_s10 = sshll.u32 %s803_s19, 3 }
  0x2a   : > { %s260_s7 = scalar_lea.vmem %s792_s2, %s532_s18  ;;  %s255_s9 = scalar_lea.vmem %s790_s0, %s532_s18 }
  0x2b   : > { %v278_v0 = vld [vmem:[%s260_s7] sm:$0xff]  ;;  %v279_v1 = vld [vmem:[%s260_s7 + $0x8] sm:$0xff]  ;;  %s268_s13 = scalar_lea.vmem %s794_s4, %s524_s10  ;;  %s264_s21 = scalar_lea.vmem %s793_s3, %s524_s10 }
  0x2c   : > { %v281_v2 = vsel %vm280_vm0, %v278_v0, 0.0  ;;  %v282_v3 = vsel %vm280_vm0, %v279_v1, 0.0  ;;  %v269_v27 = vld [vmem:[%s255_s9] sm:$0xff]  ;;  %v270_v28 = vld [vmem:[%s255_s9 + $0x8] sm:$0xff] }
  0x2d   : > { %v283_v4 = vadd.f32 %v282_v3, %v281_v2  ;;  %v272_v29 = vsel %vm271_vm6, %v269_v27, 0.0  ;;  %v273_v30 = vsel %vm271_vm6, %v270_v28, 0.0 }
  0x2e   : > { %v274_v31 = vadd.f32 %v273_v30, %v272_v29 }
  0x2f   : > { %v284_v5 = vrot.slane %v283_v4, 4 }
  0x30   : > { %v275_v33 = vmul.f32 0.5, %v274_v31 }
  0x31   : > { %v285_v6 = vadd.f32 %v284_v5, %v283_v4 }
  0x33   : > { %v286_v7 = vrot.slane %v285_v6, 2 }
  0x35   : > { %v287_v8 = vadd.f32 %v286_v7, %v285_v6 }
  0x37   : > { %v288_v9 = vrot.slane %v287_v8, 1 }
  0x39   : > { %v289_v11 = vadd.f32 %v288_v9, %v287_v8 }
  0x3b   : > { %v290_v12 = vadd.f32 0.0001, %v289_v11 }
  0x3d   : > { %576 = vrcp.f32 %v290_v12  ;;  %v302_v15 = vand.u32 2147483648, %v290_v12  ;;  %vm296_vm1 = vweird.f32 %v290_v12  ;;  %v300_v17 = vand.u32 2147483647, %v290_v12 }
  0x3f   : > { %v303_v19 = vor.u32 1.1754944e-38, %v302_v15  ;;  %vm301_vm4 = vcmp.eq.f32.partialorder %v300_v17, 8.507059e+37 }
  0x43   : > { %v577_v13 = vpop.eup %576 }
  0x44   : > { %v292_v14 = vmul.f32 %v577_v13, %v290_v12  ;;  %vm297_vm2 = vweird.f32 %v577_v13 }
  0x45   : > { %vm298_vm3 = vmor %vm296_vm1, %vm297_vm2 }
  0x46   : > { %v293_v16 = vsub.f32 1.0, %v292_v14 }
  0x48   : > { %v294_v18 = vmul.f32 %v577_v13, %v293_v16 }
  0x4a   : > { %v295_v20 = vadd.f32 %v577_v13, %v294_v18 }
  0x4c   : > { %v299_v21 = vsel %vm298_vm3, %v577_v13, %v295_v20 }
  0x4d   : > { %v304_v22 = vsel %vm301_vm4, %v303_v19, %v299_v21 }
  0x4e   : > { %v305_v23 = vmul.f32 %v304_v22, %v278_v0  ;;  %v306_v24 = vmul.f32 %v304_v22, %v279_v1 }
  0x50   : > { %307 = vxpose.xlu0.b32.start [1/2] (short) (narrow) %v305_v23, 8 }
  0x58   : > { %308 = vxpose.xlu0.b32.end [2/2] (short) (narrow) %v306_v24, 8 }
  0xf4   : > { %v323_v26 = vpop.trf.xlu0 }
  0xf5   : > { %526 = vmatmul.msk.f32.vlgmr.msra.gmra.mxu0 %vm339_vm5, %v323_v26 }
 0x172   : > { %v360_v32 = vpop.f32.mrf.mxu0 }
 0x173   : > { %390 = vst.msk [vmem:[%s268_s13] sm:$0x1f] %vm389_vm7, %v360_v32  ;;  %527 = vmatpush.xpose.msk.msra.mxu1 %vm271_vm6, %v360_v32 }
 0x176   : > { %528 = vmatmul.msk.f32.vlgmr.msra.gmra.mxu1 %vm271_vm6, %v275_v33 }
 0x1f3   : > { %v386_v34 = vpop.f32.mrf.mxu1 }
 0x1f4   : > { %391 = vst.msk [vmem:[%s264_s21] sm:$0xff] %vm280_vm0, %v386_v34 }
 0x1f5 PF: > { %p15_p7 = scmp.ge.s32.totalorder %s693_s20, 4   ;;  %s798_s15 = smov %s634_s16 }
 0x1f6   : > { %s799_s16 = smov %s638_s17  ;;  %s800_s17 = smov %s703_s23 }
 0x1f7   : > { %s801_s18 = smov %s693_s20  ;;  %17 = sbr.rel (!%p15_p7) target bundleno = 3 (0x3), region = 90 }
 0x1fc   :  { %425 = vsyncpa [#allocation3], 1 }
 0x1fd   :  { %427 = vsyncpa [#allocation3 + $0x1], 1 }

</bundles_post_ra>
